<compile_context>
chip_gen: v7x
topology: tpu7x:2x2x1
jax: 0.10.0
libtpu: 0.0.40
codegen_flags: <defaults>
</compile_context>

<pallas_src>
import functools

import jax
import jax.numpy as jnp
from jax.experimental import pallas as pl
from jax.experimental.pallas import tpu as pltpu


def gaussian_kernel(ab_ref, ce_ref, o_ref):
    # ab_ref: (tn, 2) VMEM  -> column 0: a[n] = scale*(x0^2+x1^2)
    #                          column 1: b[n] = x0 + x1
    # ce_ref: (2, D)  VMEM  -> row 0: c[d] = -2*scale*t
    #                          row 1: e[d] =  2*scale*t^2
    # o_ref:  (tn, D) VMEM  -> exp(a + b*c + e)
    ab = ab_ref[...]                      # (tn, 2)
    ce = ce_ref[...]                      # (2, D)
    a = ab[:, 0:1]                        # (tn, 1)
    b = ab[:, 1:2]                        # (tn, 1)
    c = ce[0:1, :]                        # (1, D)
    e = ce[1:2, :]                        # (1, D)
    o_ref[...] = jnp.exp(a + b * c + e)   # 1 mul + 2 add on VPU, exp on EUP


def _round_up(v, m):
    return ((v + m - 1) // m) * m


@functools.partial(jax.jit, static_argnames=("tile_n",))
def gaussian_transform(x, t_param, sigma, *, tile_n=1024):
    """x: [N, 2] f32, t_param: [D] f32, sigma: [1] f32 -> [N, D] f32."""
    N, two = x.shape
    assert two == 2
    D = t_param.shape[0]

    x = x.astype(jnp.float32)
    t_param = t_param.astype(jnp.float32)
    sigma = sigma.astype(jnp.float32)

    # ---- hoisted scalar / per-row / per-column precompute (rank-1 form) ----
    scale = -0.5 / (sigma[0] * sigma[0])                 # -1/(2*sigma^2)
    x0 = x[:, 0]
    x1 = x[:, 1]
    ab = jnp.stack([scale * (x0 * x0 + x1 * x1),         # a[n]
                    x0 + x1],                            # b[n]
                   axis=1)                               # (N, 2)
    ce = jnp.stack([(-2.0 * scale) * t_param,            # c[d]
                    (2.0 * scale) * (t_param * t_param)],  # e[d]
                   axis=0)                               # (2, D)

    # ---- row-tile selection ----
    d_lanes = max(128, _round_up(D, 128))        # VMEM lane width of out tile
    out_budget_bytes = 8 << 20                   # double-buffered out budget
    max_rows = max(8, (out_budget_bytes // (2 * d_lanes * 4)) // 8 * 8)
    # keep >= 2 grid steps when possible so both v7x TensorCores get work
    half_rows = max(8, _round_up(pl.cdiv(N, 2), 8))
    tn = max(8, (min(tile_n, max_rows, half_rows) // 8) * 8)
    grid = (pl.cdiv(N, tn),)                     # ragged last block is fine

    # ---- right-size the VMEM request to the actual footprint ----
    vmem_bytes = (2 * tn * d_lanes * 4           # double-buffered out tile
                  + 2 * tn * 128 * 4             # double-buffered ab tile
                  + 2 * 8 * d_lanes * 4          # double-buffered ce rows
                  + (2 << 20))                   # headroom
    vmem_bytes = int(min(max(vmem_bytes, 4 << 20), 32 << 20))

    return pl.pallas_call(
        gaussian_kernel,
        out_shape=jax.ShapeDtypeStruct((N, D), jnp.float32),
        grid_spec=pltpu.PrefetchScalarGridSpec(
            num_scalar_prefetch=0,
            grid=grid,
            in_specs=[
                # per-row [a, b] tile: (tn, 2); last dim == full array dim
                pl.BlockSpec((tn, 2), lambda i: (i, 0)),
                # per-column [c; e] rows, resident across the grid
                pl.BlockSpec((2, D), lambda i: (0, 0)),
            ],
            out_specs=pl.BlockSpec((tn, D), lambda i: (i, 0)),
        ),
        compiler_params=pltpu.CompilerParams(
            dimension_semantics=("parallel",),
            vmem_limit_bytes=vmem_bytes,
        ),
    )(ab, ce)


def _reference(x, t_param, sigma):
    return jnp.exp(
        -jnp.sum((x[:, :, None] - t_param[None, None, :]) ** 2, axis=1)
        / (2.0 * sigma[0] ** 2)
    )


if __name__ == "__main__":
    key = jax.random.PRNGKey(0)
    k_x, k_t, k_x2, k_t2 = jax.random.split(key, 4)

    # ---- main case: matches the module defaults ----
    N = 64           # number of points
    output_dim = 16  # number of t parameters

    t_param = jax.random.normal(k_t, (output_dim,), dtype=jnp.float32) * 0.1
    sigma = jnp.ones((1,), dtype=jnp.float32)
    x = jax.random.normal(k_x, (N, 2), dtype=jnp.float32)

    out = jax.block_until_ready(gaussian_transform(x, t_param, sigma))
    ref = _reference(x, t_param, sigma)
    assert out.shape == (N, output_dim)
    assert jnp.allclose(out, ref, atol=1e-5, rtol=1e-5)

    # ---- ragged case: N not a multiple of the tile, D not a multiple of 8 ----
    N2, D2 = 37, 20
    t2 = jax.random.normal(k_t2, (D2,), dtype=jnp.float32) * 0.1
    x2 = jax.random.normal(k_x2, (N2, 2), dtype=jnp.float32)
    out2 = jax.block_until_ready(gaussian_transform(x2, t2, sigma))
    ref2 = _reference(x2, t2, sigma)
    assert out2.shape == (N2, D2)
    assert jnp.allclose(out2, ref2, atol=1e-5, rtol=1e-5)

    print("KERNEL_OK")
</pallas_src>

<mosaic_0001>
module attributes {stable_mosaic.version = 11 : i64} {
  func.func @gaussian_kernel(%arg0: i32, %arg1: memref<32x2xf32, #tpu.memory_space<vmem>>, %arg2: memref<2x16xf32, #tpu.memory_space<vmem>>, %arg3: memref<32x16xf32, #tpu.memory_space<vmem>>) attributes {dimension_semantics = [#tpu.dimension_semantics<parallel>], iteration_bounds = array<i64: 2>, scalar_prefetch = 0 : i64, scratch_operands = 0 : i64, tpu.core_type = #tpu.core_type<tc>, window_params = [{transform_indices = @transform_0, window_bounds = array<i64: 32, 2>}, {pipeline_mode = #tpu.pipeline_mode<synchronous>, transform_indices = @transform_1, window_bounds = array<i64: 2, 16>}, {transform_indices = @transform_2, window_bounds = array<i64: 32, 16>}]} {
    %c0 = arith.constant 0 : index
    %c0_0 = arith.constant 0 : index
    %0 = vector.load %arg1[%c0, %c0_0] : memref<32x2xf32, #tpu.memory_space<vmem>>, vector<32x2xf32>
    %c0_1 = arith.constant 0 : index
    %c0_2 = arith.constant 0 : index
    %1 = vector.load %arg2[%c0_1, %c0_2] : memref<2x16xf32, #tpu.memory_space<vmem>>, vector<2x16xf32>
    %2 = vector.extract_strided_slice %0 {offsets = [0, 0], sizes = [32, 1], strides = [1, 1]} : vector<32x2xf32> to vector<32x1xf32>
    %3 = vector.extract_strided_slice %0 {offsets = [0, 1], sizes = [32, 1], strides = [1, 1]} : vector<32x2xf32> to vector<32x1xf32>
    %4 = vector.extract_strided_slice %1 {offsets = [0, 0], sizes = [1, 16], strides = [1, 1]} : vector<2x16xf32> to vector<1x16xf32>
    %5 = vector.extract_strided_slice %1 {offsets = [1, 0], sizes = [1, 16], strides = [1, 1]} : vector<2x16xf32> to vector<1x16xf32>
    %6 = vector.broadcast %3 : vector<32x1xf32> to vector<32x16xf32>
    %7 = vector.broadcast %4 : vector<1x16xf32> to vector<32x16xf32>
    %8 = arith.mulf %6, %7 : vector<32x16xf32>
    %9 = vector.broadcast %2 : vector<32x1xf32> to vector<32x16xf32>
    %10 = arith.addf %9, %8 : vector<32x16xf32>
    %11 = vector.broadcast %5 : vector<1x16xf32> to vector<32x16xf32>
    %12 = arith.addf %10, %11 : vector<32x16xf32>
    %13 = math.exp %12 : vector<32x16xf32>
    %c0_3 = arith.constant 0 : index
    %c0_4 = arith.constant 0 : index
    %14 = vector.load %arg3[%c0_3, %c0_4] : memref<32x16xf32, #tpu.memory_space<vmem>>, vector<32x16xf32>
    tpu.vector_store %arg3[%c0_3, %c0_4], %13 {strides = array<i32>} : memref<32x16xf32, #tpu.memory_space<vmem>>, vector<32x16xf32>,
    return
  }
  func.func @transform_0(%arg0: i32) -> (i32, i32) {
    %c0_i32 = arith.constant 0 : i32
    %c0_i32_0 = arith.constant 0 : i32
    return %arg0, %c0_i32 : i32, i32
  }
  func.func @transform_1(%arg0: i32) -> (i32, i32) {
    %c0_i32 = arith.constant 0 : i32
    %c0_i32_0 = arith.constant 0 : i32
    %c0_i32_1 = arith.constant 0 : i32
    return %c0_i32, %c0_i32_0 : i32, i32
  }
  func.func @transform_2(%arg0: i32) -> (i32, i32) {
    %c0_i32 = arith.constant 0 : i32
    %c0_i32_0 = arith.constant 0 : i32
    return %arg0, %c0_i32 : i32, i32
  }
}

</mosaic_0001>

<bundles_post_ra>
// kernel: gaussian_transform.1
= control target key start
LH: loop header
LB: loop body
LE: loop exit
PB: predicated region body
PF: predicated region fallthrough
CT: control target
= control target key end

     0   :  { %s335_s9 = smov 0   ;;  %s362_s0 = inlined_call_operand.vmem [shape: f32[64,2], index: 0, kind: input, shape index: {}]   ;;  %s363_s1 = inlined_call_operand.vmem [shape: f32[2,16], index: 1, kind: input, shape index: {}]   ;;  %s364_s2 = inlined_call_operand.vmem [shape: f32[64,16], index: 2, kind: output, shape index: {}]  }
   0x1 LB: > { %s277_s10 = sadd.s32 4294967295, %s316_s9   ;;  %p281_p0 = scmp.ge.s32.totalorder %s316_s9, 1  ;;  %s316_s9 = sphi %s335_s9, %s12_s9  }
   0x2   : > { %p113_p1 = scmp.lt.s32.totalorder %s316_s9, 3 }
   0x4   : > { %p114_p2 = pnand %p281_p0, %p113_p1 }
   0x5   : > { %s282_s11 = sshll.u32 (!%p114_p2), %s277_s10, 2  ;;  %v318_v0 = vmov (!%p114_p2), 1   ;;  %v319_v4 = vmov (!%p114_p2), 0   ;;  %v172_v6 = vlaneseq (!%p114_p2)  ;;  %v151_v9 = vld [vmem:[%s363_s1] sm:$0x3] (!%p114_p2)  ;;  %vm216_vm0 = vcmask (!%p114_p2), 130048  }
   0x6   : > { %117 = sbr.rel (%p114_p2) target bundleno = 177 (0xb1), region = 28  ;;  %299 = vset.pattern.permute.xlu1 (!%p114_p2), %v318_v0  ;;  %298 = vset.pattern.permute.xlu0 (!%p114_p2), %v318_v0  ;;  %p136_p3 = scmp.lt.s32.totalorder (!%p114_p2), %s282_s11, 7 }
   0x7   : > { %v173_v7 = vshrl.u32 (!%p114_p2), %v172_v6, 7 }
   0x9   : > { %v174_v8 = vsub.s32 (!%p114_p2), 0, %v173_v7  ;;  %v202_v13 = vsub.s32 (!%p114_p2), 1, %v173_v7 }
   0xb   : > { %v175_v10 = vrot.slane (!%p114_p2), %v151_v9, %v174_v8  ;;  %v203_v16 = vrot.slane (!%p114_p2), %v151_v9, %v202_v13 }
   0xd   : > { %s366_s11 = smov (!%p136_p3, %s282_s11), 7 }
   0xe   : > { %s283_s12 = sshll.u32 %s366_s11, 3 }
   0xf   : > { %s139_s15 = scalar_lea.vmem %s362_s0, %s283_s12  ;;  %s145_s20 = scalar_lea.vmem %s364_s2, %s283_s12 }
  0x10   : > { %v149_v1 = vld [vmem:[%s139_s15 + $0x10] sm:$0xff]  ;;  %v147_v2 = vld [vmem:[%s139_s15] sm:$0xff]  ;;  %v148_v3 = vld [vmem:[%s139_s15 + $0x8] sm:$0xff] }
  0x11   : > { %164 = vperm.xlu1 %299, %v149_v1   ;;  %154 = vperm.xlu0 %298, %v147_v2   ;;  %v150_v5 = vld [vmem:[%s139_s15 + $0x18] sm:$0xff] }
  0x15   : > { %300 = vset.pattern.permute.xlu1 %v319_v4  ;;  %159 = vperm.xlu0 %298, %v148_v3  }
  0x16   : > { %181 = vperm.xlu1 %300, %v147_v2  }
  0x19   : > { %169 = vperm.xlu0 %298, %v150_v5  }
  0x1a   : > { %185 = vperm.xlu1 %300, %v148_v3  }
  0x1d   : > { %301 = vset.pattern.permute.xlu0 %v319_v4 }
  0x1e   : > { %193 = vperm.xlu1 %300, %v150_v5   ;;  %189 = vperm.xlu0 %301, %v149_v1  }
  0x90   : > { %v155_v11 = vpop.permute.xlu0 %154  ;;  %v165_v12 = vpop.permute.xlu1 %164 }
  0x91   : > { %v176_v14 = vmul.f32 %v175_v10, %v155_v11  ;;  %v178_v25 = vmul.f32 %v175_v10, %v165_v12 }
  0x94   : > { %v160_v15 = vpop.permute.xlu0 %159 }
  0x95   : > { %v182_v17 = vpop.permute.xlu1 %181  ;;  %v177_v19 = vmul.f32 %v175_v10, %v160_v15 }
  0x96   : > { %v196_v18 = vadd.f32 %v182_v17, %v176_v14 }
  0x98   : > { %v204_v20 = vadd.f32 %v203_v16, %v196_v18  ;;  %v170_v21 = vpop.permute.xlu0 %169 }
  0x99   : > { %v186_v22 = vpop.permute.xlu1 %185  ;;  %v179_v26 = vmul.f32 %v175_v10, %v170_v21 }
  0x9a   : > { %v208_v23 = vmul.f32 1.442695, %v204_v20  ;;  %v197_v24 = vadd.f32 %v186_v22, %v177_v19 }
  0x9c   : > { %302 = vpow2.f32 %v208_v23  ;;  %v205_v27 = vadd.f32 %v203_v16, %v197_v24 }
  0x9d   : > { %v194_v28 = vpop.permute.xlu1 %193  ;;  %v190_v29 = vpop.permute.xlu0 %189 }
  0x9e   : > { %v210_v30 = vmul.f32 1.442695, %v205_v27  ;;  %v199_v31 = vadd.f32 %v194_v28, %v179_v26  ;;  %v198_v32 = vadd.f32 %v190_v29, %v178_v25 }
  0xa0   : > { %304 = vpow2.f32 %v210_v30  ;;  %v207_v33 = vadd.f32 %v203_v16, %v199_v31  ;;  %v206_v34 = vadd.f32 %v203_v16, %v198_v32 }
  0xa2   : > { %v214_v35 = vmul.f32 1.442695, %v207_v33  ;;  %v212_v36 = vmul.f32 1.442695, %v206_v34 }
  0xa4   : > { %306 = vpow2.f32 %v214_v35 }
  0xa5   : > { %308 = vpow2.f32 %v212_v36 }
  0xa6   : > { %v303_v37 = vpop.eup %302 }
  0xa7   : > { %217 = vst.msk [vmem:[%s145_s20] sm:$0xff] %vm216_vm0, %v303_v37 }
  0xaa   : > { %v305_v38 = vpop.eup %304 }
  0xab   : > { %218 = vst.msk [vmem:[%s145_s20 + $0x8] sm:$0xff] %vm216_vm0, %v305_v38 }
  0xae   : > { %v307_v39 = vpop.eup %306 }
  0xaf   : > { %v309_v40 = vpop.eup %308  ;;  %220 = vst.msk [vmem:[%s145_s20 + $0x18] sm:$0xff] %vm216_vm0, %v307_v39 }
  0xb0   : > { %219 = vst.msk [vmem:[%s145_s20 + $0x10] sm:$0xff] %vm216_vm0, %v309_v40 }
  0xb1 PF: > { %s12_s9 = sadd.s32 1, %s316_s9  }
  0xb2   : > { %p9_p4 = scmp.ge.s32.totalorder %s12_s9, 4  }
  0xb4   :  { %11 = sbr.rel (!%p9_p4) target bundleno = 1 (0x1), region = 58 }

</bundles_post_ra>
